<compile_context>
chip_gen: v5e
topology: v5e:2x2
jax: 0.10.0
libtpu: 0.0.40
codegen_flags: <defaults>
</compile_context>

<pallas_src>
import functools

import jax
import jax.numpy as jnp
from jax.experimental import pallas as pl
from jax.experimental.pallas import tpu as pltpu

_EPS = 1e-12  # matches torch.nn.functional.normalize default eps


def _aesthetic_kernel(x_ref, w_ref, b_ref, o_ref, *, scale):
    # x_ref: (TB, D) VMEM tile of embeddings (any float dtype, streamed)
    # w_ref: (1, D)  VMEM lane-dense weight row (resident)
    # b_ref: (1,)    SMEM bias scalar
    # o_ref: (1, TB) VMEM lane-dense f32 output row
    x = x_ref[...].astype(jnp.float32)          # (TB, D)
    w = w_ref[...].astype(jnp.float32)          # (1, D)

    # Both row reductions go through the MXU in NT form (contract last dim of both
    # operands), so the per-row results come out lane-dense as (1, TB) rows: no
    # XLU relayout, no masked (TB, 1) column stores.  The MXU is otherwise idle
    # here; the only per-element VPU work left is the x*x multiply (+ cast).
    nt = (((1,), (1,)), ((), ()))
    s = jax.lax.dot_general(w, x, nt,
                            preferred_element_type=jnp.float32)         # (1, TB)  x . w
    ones = jnp.ones_like(w)
    sq = jax.lax.dot_general(ones, x * x, nt,
                             preferred_element_type=jnp.float32)        # (1, TB)  ||x||^2

    # 1 / max(||x||, eps) == rsqrt(max(||x||^2, eps^2)); rsqrt uses the EUP slot.
    inv_norm = jax.lax.rsqrt(jnp.maximum(sq, _EPS * _EPS))
    o_ref[...] = (s * (inv_norm * scale) + b_ref[0]).astype(o_ref.dtype)


def _round_up(x, m):
    return (x + m - 1) // m * m


def _tile_target_bytes():
    """Per-grid-step f32-tile byte target; generation dependent.

    v7x streams HBM ~2.3x faster than v6e, so the fixed ~0.35us per-grid-step
    overhead bites harder there; use bigger tiles (still << its 64 MiB/TC VMEM).
    """
    try:
        kind = jax.devices()[0].device_kind.lower()
    except Exception:
        kind = ""
    if "v7" in kind:
        return 8 << 20
    return 4 << 20


def _auto_block_b(batch, feats):
    """Pick the batch-tile size (rows per grid step)."""
    if batch <= 256:
        return batch                                    # single full block
    bb = _tile_target_bytes() // max(1, feats * 4)      # sized off the f32 tile
    bb = max(128, (bb // 128) * 128)
    bb = min(bb, 32768)
    # Keep at least two grid steps so the ("parallel",) axis can land work on
    # both TensorCores of a v7x chip.
    bb = min(bb, _round_up((batch + 1) // 2, 128))
    return bb


def aesthetic_linear_model(x, weight, bias, *, block_b=None):
    """Forward pass of AestheticMeanPredictionLinearModel.

    x: (B, D) embeddings (f32 or bf16 -- bf16 halves streamed HBM bytes, the
       kernel still accumulates in f32); weight: (1, D) (nn.Linear layout);
       bias: (1,).  Returns (B, 1) float32.
    """
    B, D = x.shape
    itemsize = jnp.dtype(x.dtype).itemsize

    if block_b is None:
        block_b = _auto_block_b(B, D)
    block_b = int(block_b)
    if block_b >= B:
        block_b = B                                     # full array in one block
    else:
        # Lane-dense (1, block_b) output blocks need block_b % 128 == 0 when tiled.
        block_b = max(128, (block_b // 128) * 128)
        if block_b >= B:
            block_b = B
    num_blocks = int(pl.cdiv(B, block_b))               # partial tail block OK
    padded_b = num_blocks * block_b                     # tail lanes are garbage

    w_row = jnp.asarray(weight, jnp.float32).reshape(1, D)   # lane-dense weight row
    b_vec = jnp.asarray(bias, jnp.float32).reshape(1)

    # VMEM budget: double-buffered x tiles + Mosaic-materialized f32 intermediates
    # (cast / x*x) + sublane-padded (8, block_b) output buffers + resident weight
    # + slack.  Capped at 48 MiB to stay inside v7x's 64 MiB/TC physical VMEM.
    x_tile = block_b * D * itemsize
    f32_tile = block_b * D * 4
    out_buf = 8 * block_b * 4
    vmem_limit = 2 * x_tile + 2 * f32_tile + 2 * out_buf + 8 * D * 4 + (2 << 20)
    vmem_limit = min(max(vmem_limit, 4 << 20), 48 << 20)

    kernel = functools.partial(_aesthetic_kernel, scale=float(D) ** 0.5)

    out_row = pl.pallas_call(
        kernel,
        out_shape=jax.ShapeDtypeStruct((1, padded_b), jnp.float32),
        grid_spec=pltpu.PrefetchScalarGridSpec(
            num_scalar_prefetch=0,
            grid=(num_blocks,),
            in_specs=[
                pl.BlockSpec((block_b, D), lambda i: (i, 0)),    # streamed x tiles
                pl.BlockSpec((1, D), lambda i: (0, 0)),          # resident weight row
                pl.BlockSpec(memory_space=pltpu.SMEM),           # bias scalar
            ],
            # Lane-dense output row: one contiguous, unmasked store per grid step.
            out_specs=pl.BlockSpec((1, block_b), lambda i: (0, i)),
        ),
        compiler_params=pltpu.CompilerParams(
            dimension_semantics=("parallel",),    # shards blocks across TCs on v7x
            vmem_limit_bytes=int(vmem_limit),
        ),
        cost_estimate=pl.CostEstimate(
            flops=5 * B * D,
            transcendentals=B,
            bytes_accessed=B * D * itemsize + D * 4 + padded_b * 4,
        ),
    )(x, w_row, b_vec)

    # Padded tail lanes (rows >= B) come from the clipped last input DMA and hold
    # garbage; they are row-local (never contaminate valid rows) and discarded here.
    return out_row[0, :B].reshape(B, 1)


if __name__ == "__main__":
    key = jax.random.PRNGKey(0)
    k_x, k_w, k_b, k_x2 = jax.random.split(key, 4)

    batch, feats_in = 16, 32
    # Round demo inputs to bf16-exact values so the numerical check is insensitive
    # to the MXU's multiply-pass precision for f32 operands.
    x = jax.random.normal(k_x, (batch, feats_in), jnp.float32)
    x = x.astype(jnp.bfloat16).astype(jnp.float32)

    bound = 1.0 / (feats_in ** 0.5)
    weight = jax.random.uniform(k_w, (1, feats_in), minval=-bound, maxval=bound,
                                dtype=jnp.float32)
    weight = weight.astype(jnp.bfloat16).astype(jnp.float32)
    bias = jax.random.uniform(k_b, (1,), minval=-bound, maxval=bound,
                              dtype=jnp.float32)

    def ref_forward(t):
        norm = jnp.maximum(jnp.linalg.norm(t, axis=-1, keepdims=True), 1e-12)
        return (t / norm) * (feats_in ** 0.5) @ weight.T + bias

    tol = dict(atol=1e-2, rtol=1e-2)   # covers MXU bf16-pass rounding of x*x

    # 1) Default tiling (single full block at this tiny size).
    out = jax.block_until_ready(aesthetic_linear_model(x, weight, bias))
    assert out.shape == (batch, 1) and out.dtype == jnp.float32
    assert jnp.allclose(out, ref_forward(x), **tol)

    # 2) Multi-block grid with a partial tail block (B=300, block_b=128 -> 3 blocks).
    big_b = 300
    x_big = jax.random.normal(k_x2, (big_b, feats_in), jnp.float32)
    x_big = x_big.astype(jnp.bfloat16).astype(jnp.float32)
    out_big = jax.block_until_ready(
        aesthetic_linear_model(x_big, weight, bias, block_b=128))
    assert out_big.shape == (big_b, 1) and out_big.dtype == jnp.float32
    assert jnp.allclose(out_big, ref_forward(x_big), **tol)

    print("KERNEL_OK")
</pallas_src>

<mosaic_0001>
module attributes {stable_mosaic.version = 11 : i64} {
  func.func @_aesthetic_kernel(%arg0: i32, %arg1: memref<16x32xf32, #tpu.memory_space<vmem>>, %arg2: memref<1x32xf32, #tpu.memory_space<vmem>>, %arg3: memref<1xf32, #tpu.memory_space<smem>>, %arg4: memref<1x16xf32, #tpu.memory_space<vmem>>) attributes {dimension_semantics = [#tpu.dimension_semantics<parallel>], iteration_bounds = array<i64: 1>, scalar_prefetch = 0 : i64, scratch_operands = 0 : i64, tpu.core_type = #tpu.core_type<tc>, window_params = [{transform_indices = @transform_0, window_bounds = array<i64: 16, 32>}, {pipeline_mode = #tpu.pipeline_mode<synchronous>, transform_indices = @transform_1, window_bounds = array<i64: 1, 32>}, {transform_indices = @transform_2, window_bounds = array<i64: 1>}, {transform_indices = @transform_3, window_bounds = array<i64: 1, 16>}]} {
    %c0 = arith.constant 0 : index
    %c0_0 = arith.constant 0 : index
    %0 = vector.load %arg1[%c0, %c0_0] : memref<16x32xf32, #tpu.memory_space<vmem>>, vector<16x32xf32>
    %c0_1 = arith.constant 0 : index
    %c0_2 = arith.constant 0 : index
    %1 = vector.load %arg2[%c0_1, %c0_2] : memref<1x32xf32, #tpu.memory_space<vmem>>, vector<1x32xf32>
    %cst = arith.constant dense<0.000000e+00> : vector<1x16xf32>
    %2 = tpu.matmul %1, %0, %cst {dimension_numbers = #tpu.dot_dimension_numbers<[1], [1], [0], [0], [0, 0, 1, 0], [], []>} : vector<1x32xf32>, vector<16x32xf32>, vector<1x16xf32> -> vector<1x16xf32>
    %cst_3 = arith.constant 1.000000e+00 : f32
    %3 = vector.broadcast %cst_3 : f32 to vector<1x32xf32>
    %4 = arith.mulf %0, %0 : vector<16x32xf32>
    %cst_4 = arith.constant dense<0.000000e+00> : vector<1x16xf32>
    %5 = tpu.matmul %3, %4, %cst_4 {dimension_numbers = #tpu.dot_dimension_numbers<[1], [1], [0], [0], [0, 0, 1, 0], [], []>} : vector<1x32xf32>, vector<16x32xf32>, vector<1x16xf32> -> vector<1x16xf32>
    %cst_5 = arith.constant 1.000000e-24 : f32
    %6 = vector.broadcast %cst_5 : f32 to vector<1x16xf32>
    %7 = arith.maximumf %5, %6 : vector<1x16xf32>
    %8 = math.rsqrt %7 : vector<1x16xf32>
    %cst_6 = arith.constant 5.65685415 : f32
    %9 = vector.broadcast %cst_6 : f32 to vector<1x16xf32>
    %10 = arith.mulf %8, %9 : vector<1x16xf32>
    %11 = arith.mulf %2, %10 : vector<1x16xf32>
    %c0_7 = arith.constant 0 : index
    %12 = memref.load %arg3[%c0_7] : memref<1xf32, #tpu.memory_space<smem>>
    %13 = vector.broadcast %12 : f32 to vector<1x16xf32>
    %14 = arith.addf %11, %13 : vector<1x16xf32>
    %c0_8 = arith.constant 0 : index
    %c0_9 = arith.constant 0 : index
    %15 = vector.load %arg4[%c0_8, %c0_9] : memref<1x16xf32, #tpu.memory_space<vmem>>, vector<1x16xf32>
    tpu.vector_store %arg4[%c0_8, %c0_9], %14 {strides = array<i32>} : memref<1x16xf32, #tpu.memory_space<vmem>>, vector<1x16xf32>,
    return
  }
  func.func @transform_0(%arg0: i32) -> (i32, i32) {
    %c0_i32 = arith.constant 0 : i32
    %c0_i32_0 = arith.constant 0 : i32
    return %arg0, %c0_i32 : i32, i32
  }
  func.func @transform_1(%arg0: i32) -> (i32, i32) {
    %c0_i32 = arith.constant 0 : i32
    %c0_i32_0 = arith.constant 0 : i32
    %c0_i32_1 = arith.constant 0 : i32
    return %c0_i32, %c0_i32_0 : i32, i32
  }
  func.func @transform_2(%arg0: i32) -> i32 {
    %c0_i32 = arith.constant 0 : i32
    %c0_i32_0 = arith.constant 0 : i32
    return %c0_i32 : i32
  }
  func.func @transform_3(%arg0: i32) -> (i32, i32) {
    %c0_i32 = arith.constant 0 : i32
    %c0_i32_0 = arith.constant 0 : i32
    return %c0_i32, %arg0 : i32, i32
  }
}

</mosaic_0001>

<bundles_post_ra>
// kernel: tpu_custom_call.1
= control target key start
LH: loop header
LB: loop body
LE: loop exit
PB: predicated region body
PF: predicated region fallthrough
CT: control target
= control target key end

     0   :  { %9 = vsyncpa [#allocation4], 0  ;;  %s233_s0 = inlined_call_operand.hbm [shape: f32[16,32], index: 0, kind: input, shape index: {}]   ;;  %s234_s1 = inlined_call_operand.vmem [shape: f32[1,32], index: 1, kind: input, shape index: {}]   ;;  %s235_s2 = inlined_call_operand.<no memory space> [shape: f32[1], index: 2, kind: input, shape index: {}]   ;;  %s236_s3 = inlined_call_operand.hbm [shape: f32[1,16], index: 3, kind: output, shape index: {}]  }
   0x1   :  { %10 = vsyncpa [#allocation5], 0  ;;  %s15_s14 = sshll.u32 %s233_s0, 4  ;;  %s196_s15 = smov [#allocation3]   ;;  %s16_s14 = int_to_ptr.hbm [resolvable:$true] %s15_s14 }
   0x2   :  { %s17_s16 = sshll.u32 %s196_s15, 4  ;;  %s197_s17 = smov 128   ;;  %s18_s16 = int_to_ptr.vmem [resolvable:$true] %s17_s16 }
   0x3   :  { %s198_s18 = smov 8  }
   0x4   :  { %23 = dma.hbm_to_vmem [thread:$0]  %s16_s14, 256, %s18_s16, [#allocation4], %s197_s17, %s197_s17, %s198_s18  }
   0x5   :  { %192 = dma.done.wait [#allocation4], 256  }
   0x6   :  { %193 = vsyncadd [#allocation4], 4294967040  ;;  %v33_v0 = vld [vmem:[#allocation3 + $0x8] sm:$0xff]  ;;  %vm35_vm0 = vcmask 261120   ;;  %v32_v1 = vld [vmem:[#allocation3] sm:$0xff]  ;;  %v199_v5 = vmov 1.0   ;;  %v110_v17 = vstv %s235_s2 }
   0x7   :  { %v66_v2 = vmul.f32 %v33_v0, %v33_v0  ;;  %131 = vmatpush.xpose.msk.msra.mxu0 %vm35_vm0, %v33_v0  ;;  %v65_v3 = vmul.f32 %v32_v1, %v32_v1  ;;  %v34_v4 = vld [vmem:[%s234_s1] sm:$0x1]  ;;  %s200_s21 = smov [#allocation6]   ;;  %s121_s25 = sshll.u32 %s236_s3, 4  ;;  %vm112_vm4 = vcmask 122880   ;;  %s122_s25 = int_to_ptr.hbm [resolvable:$true] %s121_s25 }
   0x8   :  { %s119_s22 = sshll.u32 %s200_s21, 4  ;;  %s120_s22 = int_to_ptr.vmem [resolvable:$true] %s119_s22 }
   0x9   :  { %134 = vmatpush.xpose.msk.msra.mxu1 %vm35_vm0, %v66_v2 }
   0xb   :  { %132 = vmatpush.xpose.msk.msra.mxu0 %vm35_vm0, %v32_v1 }
   0xd   :  { %135 = vmatpush.xpose.msk.msra.mxu1 %vm35_vm0, %v65_v3 }
   0xe   :  { %133 = vmatmul.msk.f32.vlgmr.msra.gmra.mxu0 %vm35_vm0, %v34_v4 }
  0x10   :  { %136 = vmatmul.msk.f32.vlgmr.msra.gmra.mxu1 %vm35_vm0, %v199_v5 }
  0x8b   :  { %v62_v14 = vpop.f32.mrf.mxu0 }
  0x8d   :  { %v93_v6 = vpop.f32.mrf.mxu1 }
  0x8e   :  { %v96_v7 = vmax.f32 %v93_v6, 1e-24 }
  0x90   :  { %142 = vrsqrt.f32 %v96_v7  ;;  %vm103_vm2 = vweird.f32 %v96_v7 }
  0x96   :  { %v143_v8 = vpop.eup %142 }
  0x97   :  { %v98_v9 = vmul.f32 %v143_v8, %v96_v7  ;;  %vm104_vm1 = vweird.f32 %v143_v8 }
  0x98   :  { %vm105_vm3 = vmor %vm103_vm2, %vm104_vm1 }
  0x99   :  { %v99_v10 = vmul.f32 %v143_v8, %v98_v9 }
  0x9b   :  { %v100_v11 = vmul.f32 0.5, %v99_v10 }
  0x9d   :  { %v101_v12 = vsub.f32 1.5, %v100_v11 }
  0x9f   :  { %v102_v13 = vmul.f32 %v143_v8, %v101_v12 }
  0xa1   :  { %v106_v15 = vsel %vm105_vm3, %v143_v8, %v102_v13 }
  0xa2   :  { %v107_v16 = vmul.f32 5.656854, %v106_v15 }
  0xa4   :  { %v108_v18 = vmul.f32 %v107_v16, %v62_v14 }
  0xa6   :  { %v111_v19 = vadd.f32 %v110_v17, %v108_v18 }
  0xa8   :  { %113 = vst.msk [vmem:[#allocation6] sm:$0x1] %vm112_vm4, %v111_v19 }
  0xa9   :  { %124 = dma.vmem_to_hbm [thread:$0]  %s120_s22, 16, %s122_s25, [#allocation5]  }
  0xaa   :  { %194 = dma.done.wait [#allocation5], 16  }
  0xab   :  { %195 = vsyncadd [#allocation5], 4294967280 }
  0xac   :  { %129 = vsyncpa [#allocation4], 1 }
  0xad   :  { %130 = vsyncpa [#allocation5], 1 }

</bundles_post_ra>
